<compile_context>
chip_gen: v7x
topology: tpu7x:2x2x1
jax: 0.10.0
libtpu: 0.0.40
codegen_flags: <defaults>
</compile_context>

<pallas_src>
import numpy as np
import jax
import jax.numpy as jnp
from jax import lax
from jax.experimental import pallas as pl
from jax.experimental.pallas import tpu as pltpu

BLANK = 0  # module default: blank=0
_DEFAULT_VMEM_BYTES = 64 * 1024 * 1024  # v7x per-TensorCore VMEM (most constrained)

# Flipped to False if the lane-dense kernel ever fails to lower on this backend.
_LANE_DENSE_OK = [True]


# ----------------------------------------------------------------------------
# Helpers.
# ----------------------------------------------------------------------------
def _round_up(x: int, m: int) -> int:
    return ((int(x) + m - 1) // m) * m


def _vmem_capacity_bytes() -> int:
    """Physical VMEM of the attached TPU (fallback: conservative v7x value)."""
    try:
        info = pltpu.get_tpu_info()
        for attr in ("vmem_capacity_bytes", "vmem_size_bytes", "vmem_bytes"):
            val = getattr(info, attr, None)
            if val:
                return int(val)
    except Exception:
        pass
    return _DEFAULT_VMEM_BYTES


def _plan(T: int, C: int, itemsize: int, block_time=None):
    """Pick the fold factor and per-block folded-row count."""
    # Fold k consecutive time steps onto the 128 lanes of one row when C is a
    # small power-of-two divisor of 128 (C=32 -> k=4).  The host-side reshape
    # (T, C) -> (T//k, k*C) is contiguous (no data movement).
    k = 1
    if 0 < C < 128 and 128 % C == 0 and 128 // C <= 16:
        k = 128 // C
    width = k * C                        # lanes carrying real data per row
    width_p = _round_up(width, 128)      # lane-PADDED width resident in VMEM
    rows = max(1, pl.cdiv(T, k))         # folded rows carrying real data

    vmem = _vmem_capacity_bytes()
    # Lane-padded VMEM bytes per folded row of this pipeline:
    #   2 double-buffered input rows + ~4 block-sized f32/i32 temporaries
    #   (upcast emission, masked values, candidate indices, masks)
    #   + 2 buffered output rows (k int32 each).
    per_row = width_p * (2 * itemsize + 4 * 4) + 2 * k * 4
    cap_rows = max(128, ((vmem // 4) // per_row) // 128 * 128)

    # ~2 MiB of emission per grid step amortizes the ~0.35 us per-step overhead
    # (measured tiling data hits ~85% of HBM roofline well below this).
    tgt_rows = max(256, _round_up((2 << 20) // max(width * itemsize, 1), 128))

    tile_r = min(cap_rows, tgt_rows)
    if block_time is not None:
        tile_r = min(tile_r, max(128, _round_up(pl.cdiv(int(block_time), k), 128)))
    tile_r = min(tile_r, _round_up(rows, 128))  # never bigger than the data

    n_blocks = pl.cdiv(rows, tile_r)
    # Prefer an even number of >= 2 grid steps: >= 2 enables DMA/compute overlap,
    # even splits the "parallel" time axis over v7x's two TensorCores.
    if n_blocks % 2 == 1 and rows > 128:
        alt_tile = max(128, _round_up(pl.cdiv(rows, n_blocks + 1), 128))
        if pl.cdiv(rows, alt_tile) % 2 == 0:
            tile_r, n_blocks = alt_tile, pl.cdiv(rows, alt_tile)

    return k, width, tile_r, n_blocks, per_row


# ----------------------------------------------------------------------------
# Fast-path kernel: segmented per-frame argmax, lane-dense int32 row output.
#   input block  : (tile_r, k*C)  — k time steps folded onto the lanes per row
#   output block : (1, k, tile_r) — out[0, s, r] = argmax of time step r*k + s
# ----------------------------------------------------------------------------
def _make_best_path_kernel(n_seg: int, seg_width: int):
    def kernel(em_ref, out_ref):
        em = em_ref[...].astype(jnp.float32)            # (tile_r, n_seg*seg_width)
        rows, width = em.shape
        lane = lax.broadcasted_iota(jnp.int32, (rows, width), 1)
        if n_seg > 1:
            seg_id = lane // seg_width                  # power-of-two -> shift
            cls_id = lane - seg_id * seg_width          # class index in segment
        else:
            seg_id = None
            cls_id = lane
        neg_inf = jnp.float32(-jnp.inf)
        sentinel = jnp.int32(seg_width)                 # > any valid class index
        for s in range(n_seg):                          # static, fully unrolled
            vals = em if n_seg == 1 else jnp.where(seg_id == s, em, neg_inf)
            seg_max = jnp.max(vals, axis=-1, keepdims=True)
            # First-max tie-break; `| isnan` keeps np.argmax / torch.argmax NaN
            # parity (drop it if emissions are known NaN-free).
            hit = (vals == seg_max) | jnp.isnan(vals)
            cand = jnp.where(hit, cls_id, sentinel)
            out_ref[0, s] = jnp.min(cand, axis=-1)      # (tile_r,) lane-dense row
    return kernel


# ----------------------------------------------------------------------------
# Fallback kernel (previously validated v2): column output, kept only for
# lowering robustness if the lane-dense store does not lower on this backend.
# ----------------------------------------------------------------------------
def _best_path_kernel_col(em_ref, best_ref):
    em = em_ref[...].astype(jnp.float32)                # (tile_t, C)
    tt, c = em.shape
    col = lax.broadcasted_iota(jnp.int32, (tt, c), 1)
    maxv = jnp.max(em, axis=-1, keepdims=True)
    hit = (em == maxv) | jnp.isnan(em)
    cand = jnp.where(hit, col, jnp.int32(c))
    best_ref[...] = jnp.min(cand, axis=-1, keepdims=True).astype(jnp.int32)


# ----------------------------------------------------------------------------
# Pallas driver: per-frame argmax over classes for the whole sequence.
# ----------------------------------------------------------------------------
def _best_path_argmax(emission, block_time=None) -> np.ndarray:
    T, C = emission.shape
    itemsize = emission.dtype.itemsize
    k, width, tile_r, n_blocks, per_row = _plan(T, C, itemsize, block_time)

    rows_pad = n_blocks * tile_r
    t_pad = rows_pad * k
    em_p = emission
    if t_pad != T:
        em_p = jnp.pad(em_p, ((0, t_pad - T), (0, 0)))

    block_bytes = tile_r * per_row
    vmem_limit = int(min(_vmem_capacity_bytes() * 5 // 8,
                         max(2 * block_bytes + (12 << 20), 20 << 20)))
    params = pltpu.CompilerParams(
        # No cross-block carry: the time axis is truly data-parallel (v7x 2-TC).
        dimension_semantics=("parallel",),
        vmem_limit_bytes=vmem_limit,
    )
    cost = pl.CostEstimate(
        flops=8 * t_pad * max(C, 1),
        transcendentals=0,
        bytes_accessed=t_pad * C * itemsize + t_pad * 4,
    )

    if _LANE_DENSE_OK[0]:
        try:
            em_folded = em_p.reshape(rows_pad, width)   # contiguous, zero-cost
            best = pl.pallas_call(
                _make_best_path_kernel(k, C),
                out_shape=jax.ShapeDtypeStruct((n_blocks, k, tile_r), jnp.int32),
                grid=(n_blocks,),
                in_specs=[pl.BlockSpec((tile_r, width), lambda i: (i, 0))],
                out_specs=pl.BlockSpec((1, k, tile_r), lambda i: (i, 0, 0)),
                compiler_params=params,
                cost_estimate=cost,
            )(em_folded)
            jax.block_until_ready(best)
            # out[b, s, r] is the argmax of time step (b*tile_r + r)*k + s.
            return np.asarray(best).transpose(0, 2, 1).reshape(-1)[:T]
        except Exception:
            _LANE_DENSE_OK[0] = False                   # lowering fallback only

    best = pl.pallas_call(
        _best_path_kernel_col,
        out_shape=jax.ShapeDtypeStruct((t_pad, 1), jnp.int32),
        grid=(n_blocks * k,),
        in_specs=[pl.BlockSpec((tile_r, C), lambda i: (i, 0))],
        out_specs=pl.BlockSpec((tile_r, 1), lambda i: (i, 0)),
        compiler_params=params,
        cost_estimate=cost,
    )(em_p)
    jax.block_until_ready(best)
    return np.asarray(best).reshape(-1)[:T]


# ----------------------------------------------------------------------------
# Public wrapper: same semantics as GreedyCTCDecoder.forward.
# ----------------------------------------------------------------------------
def greedy_ctc_decode(emission, blank: int = BLANK, block_time=None):
    """emission: (T, C) float array.  Returns a Python list of int labels
    (best path, repeats collapsed, blank/0 removed) exactly mirroring the
    reference torch module's forward()."""
    emission = jnp.asarray(emission)
    if emission.ndim != 2:
        raise ValueError("emission must be (T, C)")
    T, _ = emission.shape
    if T == 0:
        return []

    best = _best_path_argmax(emission, block_time=block_time)  # (T,) int32

    # TODO(synk): the collapse produces a dynamic-length Python list, which has
    # no tensor/Pallas representation; it is an O(T) pass over int32 on the host
    # and mirrors the torch loop literally (including its `label != 0` check).
    prev = np.concatenate(([np.int32(blank)], best[:-1]))
    keep = (best != prev) & (best != blank) & (best != 0)
    return [int(x) for x in best[keep]]


# ----------------------------------------------------------------------------
# Pure-NumPy reference (mirrors the PyTorch module).
# ----------------------------------------------------------------------------
def _reference_decode(emission_np: np.ndarray, blank: int = BLANK):
    best_path = np.argmax(emission_np, axis=-1)
    indices = []
    previous_label = blank
    for label in best_path:
        if label != previous_label:
            if label != blank and label != 0:
                indices.append(int(label))
        previous_label = label
    return indices


if __name__ == "__main__":
    # small shapes: seq=8 time steps, hidden=32 label classes
    T, C = 8, 32
    key = jax.random.PRNGKey(0)
    emission = jax.random.normal(key, (T, C), dtype=jnp.float32)

    # make the example interesting: force a repeat and a blank frame
    emission = emission.at[2, :].set(emission[1, :])      # repeat of t=1's argmax
    emission = emission.at[4, BLANK].set(100.0)           # blank at t=4

    out = greedy_ctc_decode(emission)
    ref = _reference_decode(np.asarray(emission))
    assert out == ref, f"mismatch: kernel={out} ref={ref}"

    # exercise the multi-block pipelined path (grid > 1) with a longer sequence
    T2 = 1500
    em2 = jax.random.normal(jax.random.PRNGKey(0), (T2, C), dtype=jnp.float32)
    out2 = greedy_ctc_decode(em2, block_time=512)         # several 128-row blocks
    ref2 = _reference_decode(np.asarray(em2))
    assert out2 == ref2, f"mismatch: kernel(len={len(out2)}) vs ref(len={len(ref2)})"

    print("KERNEL_OK")
</pallas_src>

<mosaic_0001>
module attributes {stable_mosaic.version = 11 : i64} {
  func.func @_best_path_kernel_col(%arg0: i32, %arg1: memref<128x32xf32, #tpu.memory_space<vmem>>, %arg2: memref<128x1xi32, #tpu.memory_space<vmem>>) attributes {dimension_semantics = [#tpu.dimension_semantics<parallel>], iteration_bounds = array<i64: 4>, scalar_prefetch = 0 : i64, scratch_operands = 0 : i64, tpu.core_type = #tpu.core_type<tc>, window_params = [{transform_indices = @transform_0, window_bounds = array<i64: 128, 32>}, {transform_indices = @transform_1, window_bounds = array<i64: 128, 1>}]} {
    %c0 = arith.constant 0 : index
    %c0_0 = arith.constant 0 : index
    %0 = vector.load %arg1[%c0, %c0_0] : memref<128x32xf32, #tpu.memory_space<vmem>>, vector<128x32xf32>
    %1 = tpu.iota {dimensions = array<i32: 1>} : vector<128x32xi32>
    %cst = arith.constant dense<0xFF800000> : vector<128xf32>
    %2 = vector.multi_reduction <maximumf>, %0, %cst [1] : vector<128x32xf32> to vector<128xf32>
    %3 = vector.shape_cast %2 : vector<128xf32> to vector<128x1xf32>
    %4 = vector.broadcast %3 : vector<128x1xf32> to vector<128x32xf32>
    %5 = arith.cmpf oeq, %0, %4 : vector<128x32xf32>
    %6 = arith.cmpf one, %0, %0 : vector<128x32xf32>
    %7 = arith.ori %5, %6 : vector<128x32xi1>
    %c32_i32 = arith.constant 32 : i32
    %8 = vector.broadcast %c32_i32 : i32 to vector<128x32xi32>
    %9 = arith.select %7, %1, %8 : vector<128x32xi1>, vector<128x32xi32>
    %cst_1 = arith.constant dense<2147483647> : vector<128xi32>
    %10 = vector.multi_reduction <minsi>, %9, %cst_1 [1] : vector<128x32xi32> to vector<128xi32>
    %11 = vector.shape_cast %10 : vector<128xi32> to vector<128x1xi32>
    %c0_2 = arith.constant 0 : index
    %c0_3 = arith.constant 0 : index
    %12 = vector.load %arg2[%c0_2, %c0_3] : memref<128x1xi32, #tpu.memory_space<vmem>>, vector<128x1xi32>
    tpu.vector_store %arg2[%c0_2, %c0_3], %11 {strides = array<i32>} : memref<128x1xi32, #tpu.memory_space<vmem>>, vector<128x1xi32>,
    return
  }
  func.func @transform_0(%arg0: i32) -> (i32, i32) {
    %c0_i32 = arith.constant 0 : i32
    %c0_i32_0 = arith.constant 0 : i32
    return %arg0, %c0_i32 : i32, i32
  }
  func.func @transform_1(%arg0: i32) -> (i32, i32) {
    %c0_i32 = arith.constant 0 : i32
    %c0_i32_0 = arith.constant 0 : i32
    return %arg0, %c0_i32 : i32, i32
  }
}

</mosaic_0001>

<bundles_post_ra>
// kernel: tpu_custom_call.1
= control target key start
LH: loop header
LB: loop body
LE: loop exit
PB: predicated region body
PF: predicated region fallthrough
CT: control target
= control target key end

     0   :  { %s601_s6 = smov 0   ;;  %s1003_s0 = inlined_call_operand.vmem [shape: f32[512,32], index: 0, kind: input, shape index: {}]   ;;  %s1004_s1 = inlined_call_operand.vmem [shape: s32[512,1], index: 1, kind: output, shape index: {}]  }
   0x1 LB: > { %s564_s7 = sadd.s32 4294967295, %s589_s6   ;;  %p568_p0 = scmp.ge.s32.totalorder %s589_s6, 1  ;;  %s589_s6 = sphi %s601_s6, %s11_s6  }
   0x2   : > { %p88_p1 = scmp.lt.s32.totalorder %s589_s6, 5 }
   0x4   : > { %p89_p2 = pnand %p568_p0, %p88_p1 }
   0x5   : > { %s569_s8 = sshll.u32 (!%p89_p2), %s564_s7, 4  ;;  %vm138_vm0 = vcmask (!%p89_p2), 261120   ;;  %v136_v32 = vlaneseq (!%p89_p2) }
   0x6   : > { %92 = sbr.rel (%p89_p2) target bundleno = 491 (0x1eb), region = 24  ;;  %p109_p3 = scmp.lt.s32.totalorder (!%p89_p2), %s569_s8, 63 }
   0x7   : > { %v693_v33 = vand.u32 (!%p89_p2), 127, %v136_v32 }
   0xd   : > { %s1006_s8 = smov (!%p109_p3, %s569_s8), 63 }
   0xe   : > { %s570_s9 = sshll.u32 %s1006_s8, 3 }
   0xf   : > { %s617_s12 = scalar_lea.vmem %s1003_s0, %s570_s9  ;;  %s953_s15 = scalar_lea.vmem %s1004_s1, %s570_s9 }
  0x10   : > { %v120_v0 = vld [vmem:[%s617_s12] sm:$0xff]  ;;  %v122_v1 = vld [vmem:[%s617_s12 + $0x10] sm:$0xff]  ;;  %v622_v2 = vld [vmem:[%s617_s12 + $0x8] sm:$0xff] }
  0x11   : > { %v139_v3 = vsel %vm138_vm0, %v120_v0, -inf  ;;  %v145_v4 = vsel %vm138_vm0, %v122_v1, -inf  ;;  %v627_v5 = vld [vmem:[%s617_s12 + $0x18] sm:$0xff]  ;;  %v142_v6 = vsel %vm138_vm0, %v622_v2, -inf  ;;  %v634_v8 = vld [vmem:[%s617_s12 + $0x20] sm:$0xff]  ;;  %v637_v9 = vld [vmem:[%s617_s12 + $0x28] sm:$0xff]  ;;  %vm203_vm1 = vcmp.ne.f32.partialorder %v120_v0, %v120_v0 }
  0x12   : > { %140 = vmax.xlane.f32.xlu0 %v139_v3  ;;  %146 = vmax.xlane.f32.xlu1 %v145_v4  ;;  %v148_v7 = vsel %vm138_vm0, %v627_v5, -inf  ;;  %v151_v10 = vsel %vm138_vm0, %v634_v8, -inf  ;;  %v154_v11 = vsel %vm138_vm0, %v637_v9, -inf  ;;  %v644_v12 = vld [vmem:[%s617_s12 + $0x30] sm:$0xff]  ;;  %v647_v13 = vld [vmem:[%s617_s12 + $0x38] sm:$0xff]  ;;  %v654_v16 = vld [vmem:[%s617_s12 + $0x40] sm:$0xff]  ;;  %vm205_vm2 = vcmp.ne.f32.partialorder %v122_v1, %v122_v1 }
  0x13   : > { %v157_v14 = vsel %vm138_vm0, %v644_v12, -inf  ;;  %v160_v15 = vsel %vm138_vm0, %v647_v13, -inf  ;;  %v657_v17 = vld [vmem:[%s617_s12 + $0x48] sm:$0xff]  ;;  %v163_v18 = vsel %vm138_vm0, %v654_v16, -inf  ;;  %v664_v20 = vld [vmem:[%s617_s12 + $0x50] sm:$0xff]  ;;  %v667_v21 = vld [vmem:[%s617_s12 + $0x58] sm:$0xff]  ;;  %vm204_vm7 = vcmp.ne.f32.partialorder %v622_v2, %v622_v2 }
  0x14   : > { %v166_v19 = vsel %vm138_vm0, %v657_v17, -inf  ;;  %v169_v22 = vsel %vm138_vm0, %v664_v20, -inf  ;;  %v172_v23 = vsel %vm138_vm0, %v667_v21, -inf  ;;  %v674_v24 = vld [vmem:[%s617_s12 + $0x60] sm:$0xff]  ;;  %v677_v25 = vld [vmem:[%s617_s12 + $0x68] sm:$0xff]  ;;  %v684_v28 = vld [vmem:[%s617_s12 + $0x70] sm:$0xff]  ;;  %vm206_vm8 = vcmp.ne.f32.partialorder %v627_v5, %v627_v5 }
  0x15   : > { %v175_v26 = vsel %vm138_vm0, %v674_v24, -inf  ;;  %v178_v27 = vsel %vm138_vm0, %v677_v25, -inf  ;;  %v687_v29 = vld [vmem:[%s617_s12 + $0x78] sm:$0xff]  ;;  %v181_v30 = vsel %vm138_vm0, %v684_v28, -inf  ;;  %vm207_vm13 = vcmp.ne.f32.partialorder %v634_v8, %v634_v8 }
  0x16   : > { %143 = vmax.xlane.f32.xlu0 %v142_v6  ;;  %149 = vmax.xlane.f32.xlu1 %v148_v7  ;;  %v184_v31 = vsel %vm138_vm0, %v687_v29, -inf  ;;  %vm208_vm14 = vcmp.ne.f32.partialorder %v637_v9, %v637_v9 }
  0x1a   : > { %152 = vmax.xlane.f32.xlu0 %v151_v10  ;;  %155 = vmax.xlane.f32.xlu1 %v154_v11 }
  0x1e   : > { %158 = vmax.xlane.f32.xlu0 %v157_v14  ;;  %161 = vmax.xlane.f32.xlu1 %v160_v15 }
  0x22   : > { %164 = vmax.xlane.f32.xlu0 %v163_v18  ;;  %167 = vmax.xlane.f32.xlu1 %v166_v19 }
  0x26   : > { %170 = vmax.xlane.f32.xlu0 %v169_v22  ;;  %173 = vmax.xlane.f32.xlu1 %v172_v23 }
  0x2a   : > { %176 = vmax.xlane.f32.xlu0 %v175_v26  ;;  %179 = vmax.xlane.f32.xlu1 %v178_v27 }
  0x2e   : > { %182 = vmax.xlane.f32.xlu0 %v181_v30  ;;  %185 = vmax.xlane.f32.xlu1 %v184_v31 }
  0x9f   : > { %v141_v34 = vpop.xlane.xlu0 %140  ;;  %v147_v35 = vpop.xlane.xlu1 %146 }
  0xa0   : > { %vm187_vm3 = vcmp.eq.f32.partialorder %v120_v0, %v141_v34  ;;  %vm189_vm4 = vcmp.eq.f32.partialorder %v122_v1, %v147_v35 }
  0xa1   : > { %vm219_vm5 = vmor %vm187_vm3, %vm203_vm1 }
  0xa2   : > { %v235_v36 = vsel %vm219_vm5, %v693_v33, 32  ;;  %vm221_vm6 = vmor %vm189_vm4, %vm205_vm2  ;;  %vm209_vm4 = vcmp.ne.f32.partialorder %v644_v12, %v644_v12  ;;  %vm210_vm5 = vcmp.ne.f32.partialorder %v647_v13, %v647_v13 }
  0xa3   : > { %v237_v37 = vsel %vm221_vm6, %v693_v33, 32  ;;  %v144_v38 = vpop.xlane.xlu0 %143  ;;  %v150_v39 = vpop.xlane.xlu1 %149  ;;  %v702_v40 = vsel %vm138_vm0, %v235_v36, 2147483647 }
  0xa4   : > { %vm188_vm9 = vcmp.eq.f32.partialorder %v622_v2, %v144_v38  ;;  %vm190_vm10 = vcmp.eq.f32.partialorder %v627_v5, %v150_v39  ;;  %v253_v41 = vshra.s32 %v702_v40, 16  ;;  %v708_v42 = vsel %vm138_vm0, %v237_v37, 2147483647 }
  0xa5   : > { %vm220_vm11 = vmor %vm188_vm9, %vm204_vm7  ;;  %v283_v43 = vshra.s32 %v708_v42, 16 }
  0xa6   : > { %v236_v44 = vsel %vm220_vm11, %v693_v33, 32  ;;  %vm222_vm12 = vmor %vm190_vm10, %vm206_vm8  ;;  %v714_v45 = vcvt.s32.f32 %v253_v41  ;;  %vm211_vm10 = vcmp.ne.f32.partialorder %v654_v16, %v654_v16  ;;  %vm212_vm11 = vcmp.ne.f32.partialorder %v657_v17, %v657_v17 }
  0xa7   : > { %v238_v46 = vsel %vm222_vm12, %v693_v33, 32  ;;  %v153_v47 = vpop.xlane.xlu0 %152  ;;  %v156_v48 = vpop.xlane.xlu1 %155  ;;  %v719_v49 = vcvt.s32.f32 %v283_v43  ;;  %v722_v50 = vsel %vm138_vm0, %v236_v44, 2147483647 }
  0xa8   : > { %vm191_vm15 = vcmp.eq.f32.partialorder %v634_v8, %v153_v47  ;;  %256 = vmin.xlane.f32.xlu0 %v714_v45  ;;  %vm192_vm1 = vcmp.eq.f32.partialorder %v637_v9, %v156_v48  ;;  %v268_v51 = vshra.s32 %v722_v50, 16  ;;  %v729_v52 = vsel %vm138_vm0, %v238_v46, 2147483647 }
  0xa9   : > { %vm223_vm2 = vmor %vm191_vm15, %vm207_vm13  ;;  %v298_v53 = vshra.s32 %v729_v52, 16 }
  0xaa   : > { %v239_v54 = vsel %vm223_vm2, %v693_v33, 32  ;;  %vm224_vm3 = vmor %vm192_vm1, %vm208_vm14  ;;  %v735_v55 = vcvt.s32.f32 %v268_v51  ;;  %vm213_vm1 = vcmp.ne.f32.partialorder %v664_v20, %v664_v20  ;;  %vm214_vm2 = vcmp.ne.f32.partialorder %v667_v21, %v667_v21 }
  0xab   : > { %v240_v56 = vsel %vm224_vm3, %v693_v33, 32  ;;  %v159_v57 = vpop.xlane.xlu0 %158  ;;  %v162_v58 = vpop.xlane.xlu1 %161  ;;  %v740_v59 = vcvt.s32.f32 %v298_v53  ;;  %v743_v60 = vsel %vm138_vm0, %v239_v54, 2147483647 }
  0xac   : > { %vm193_vm6 = vcmp.eq.f32.partialorder %v644_v12, %v159_v57  ;;  %286 = vmin.xlane.f32.xlu0 %v719_v49  ;;  %271 = vmin.xlane.f32.xlu1 %v735_v55  ;;  %vm194_vm7 = vcmp.eq.f32.partialorder %v647_v13, %v162_v58  ;;  %v313_v61 = vshra.s32 %v743_v60, 16  ;;  %v751_v62 = vsel %vm138_vm0, %v240_v56, 2147483647 }
  0xad   : > { %vm225_vm8 = vmor %vm193_vm6, %vm209_vm4  ;;  %v328_v63 = vshra.s32 %v751_v62, 16  ;;  %v252_v57 = vand.u32 65535, %v702_v40  ;;  %v297_v40 = vand.u32 65535, %v729_v52  ;;  %v327_v52 = vand.u32 65535, %v751_v62 }
  0xae   : > { %v241_v0 = vsel %vm225_vm8, %v693_v33, 32  ;;  %vm226_vm9 = vmor %vm194_vm7, %vm210_vm5  ;;  %v757_v1 = vcvt.s32.f32 %v313_v61  ;;  %vm215_vm7 = vcmp.ne.f32.partialorder %v674_v24, %v674_v24  ;;  %vm216_vm8 = vcmp.ne.f32.partialorder %v677_v25, %v677_v25 }
  0xaf   : > { %v242_v2 = vsel %vm226_vm9, %v693_v33, 32  ;;  %v165_v3 = vpop.xlane.xlu0 %164  ;;  %v168_v4 = vpop.xlane.xlu1 %167  ;;  %v762_v5 = vcvt.s32.f32 %v328_v63  ;;  %v765_v6 = vsel %vm138_vm0, %v241_v0, 2147483647  ;;  %v254_v61 = vcvt.s32.f32 %v252_v57 }
  0xb0   : > { %vm195_vm12 = vcmp.eq.f32.partialorder %v654_v16, %v165_v3  ;;  %301 = vmin.xlane.f32.xlu1 %v740_v59  ;;  %316 = vmin.xlane.f32.xlu0 %v757_v1  ;;  %vm196_vm13 = vcmp.eq.f32.partialorder %v657_v17, %v168_v4  ;;  %v343_v7 = vshra.s32 %v765_v6, 16  ;;  %v773_v8 = vsel %vm138_vm0, %v242_v2, 2147483647 }
  0xb1   : > { %vm227_vm14 = vmor %vm195_vm12, %vm211_vm10  ;;  %v358_v9 = vshra.s32 %v773_v8, 16  ;;  %v267_v63 = vand.u32 65535, %v722_v50  ;;  %v282_v0 = vand.u32 65535, %v708_v42  ;;  %v357_v62 = vand.u32 65535, %v773_v8 }
  0xb2   : > { %v243_v10 = vsel %vm227_vm14, %v693_v33, 32  ;;  %vm228_vm15 = vmor %vm196_vm13, %vm212_vm11  ;;  %v779_v11 = vcvt.s32.f32 %v343_v7  ;;  %vm217_vm13 = vcmp.ne.f32.partialorder %v684_v28, %v684_v28  ;;  %vm218_vm14 = vcmp.ne.f32.partialorder %v687_v29, %v687_v29 }
  0xb3   : > { %v244_v12 = vsel %vm228_vm15, %v693_v33, 32  ;;  %v171_v13 = vpop.xlane.xlu0 %170  ;;  %v174_v14 = vpop.xlane.xlu1 %173  ;;  %v784_v15 = vcvt.s32.f32 %v358_v9  ;;  %v787_v16 = vsel %vm138_vm0, %v243_v10, 2147483647  ;;  %v269_v7 = vcvt.s32.f32 %v267_v63 }
  0xb4   : > { %vm197_vm3 = vcmp.eq.f32.partialorder %v664_v20, %v171_v13  ;;  %331 = vmin.xlane.f32.xlu1 %v762_v5  ;;  %346 = vmin.xlane.f32.xlu0 %v779_v11  ;;  %vm198_vm4 = vcmp.eq.f32.partialorder %v667_v21, %v174_v14  ;;  %v373_v17 = vshra.s32 %v787_v16, 16  ;;  %v795_v18 = vsel %vm138_vm0, %v244_v12, 2147483647 }
  0xb5   : > { %vm229_vm5 = vmor %vm197_vm3, %vm213_vm1  ;;  %v388_v19 = vshra.s32 %v795_v18, 16  ;;  %v284_v9 = vcvt.s32.f32 %v282_v0  ;;  %v312_v10 = vand.u32 65535, %v743_v60  ;;  %v299_v13 = vcvt.s32.f32 %v297_v40 }
  0xb6   : > { %v245_v22 = vsel %vm229_vm5, %v693_v33, 32  ;;  %vm230_vm6 = vmor %vm198_vm4, %vm214_vm2  ;;  %v801_v20 = vcvt.s32.f32 %v373_v17  ;;  %v342_v60 = vand.u32 65535, %v765_v6  ;;  %v372_v6 = vand.u32 65535, %v787_v16 }
  0xb7   : > { %v246_v23 = vsel %vm230_vm6, %v693_v33, 32  ;;  %v177_v26 = vpop.xlane.xlu0 %176  ;;  %v180_v21 = vpop.xlane.xlu1 %179  ;;  %v806_v27 = vcvt.s32.f32 %v388_v19  ;;  %v809_v30 = vsel %vm138_vm0, %v245_v22, 2147483647  ;;  %v314_v14 = vcvt.s32.f32 %v312_v10 }
  0xb8   : > { %vm199_vm9 = vcmp.eq.f32.partialorder %v674_v24, %v177_v26  ;;  %361 = vmin.xlane.f32.xlu1 %v784_v15  ;;  %376 = vmin.xlane.f32.xlu0 %v801_v20  ;;  %vm200_vm10 = vcmp.eq.f32.partialorder %v677_v25, %v180_v21  ;;  %v403_v31 = vshra.s32 %v809_v30, 16  ;;  %v817_v32 = vsel %vm138_vm0, %v246_v23, 2147483647 }
  0xb9   : > { %vm231_vm11 = vmor %vm199_vm9, %vm215_vm7  ;;  %v418_v34 = vshra.s32 %v817_v32, 16  ;;  %v329_v22 = vcvt.s32.f32 %v327_v52  ;;  %v344_v23 = vcvt.s32.f32 %v342_v60  ;;  %v387_v8 = vand.u32 65535, %v795_v18 }
  0xba   : > { %v247_v35 = vsel %vm231_vm11, %v693_v33, 32  ;;  %vm232_vm12 = vmor %vm200_vm10, %vm216_vm8  ;;  %v823_v24 = vcvt.s32.f32 %v403_v31  ;;  %v359_v31 = vcvt.s32.f32 %v357_v62  ;;  %v402_v16 = vand.u32 65535, %v809_v30 }
  0xbb   : > { %v248_v36 = vsel %vm232_vm12, %v693_v33, 32  ;;  %v183_v37 = vpop.xlane.xlu0 %182  ;;  %v186_v25 = vpop.xlane.xlu1 %185  ;;  %v828_v38 = vcvt.s32.f32 %v418_v34  ;;  %v831_v39 = vsel %vm138_vm0, %v247_v35, 2147483647  ;;  %v374_v34 = vcvt.s32.f32 %v372_v6 }
  0xbc   : > { %vm201_vm15 = vcmp.eq.f32.partialorder %v684_v28, %v183_v37  ;;  %391 = vmin.xlane.f32.xlu1 %v806_v27  ;;  %406 = vmin.xlane.f32.xlu0 %v823_v24  ;;  %vm202_vm1 = vcmp.eq.f32.partialorder %v687_v29, %v186_v25  ;;  %v433_v41 = vshra.s32 %v831_v39, 16  ;;  %v839_v43 = vsel %vm138_vm0, %v248_v36, 2147483647 }
  0xbd   : > { %vm233_vm2 = vmor %vm201_vm15, %vm217_vm13  ;;  %v448_v44 = vshra.s32 %v839_v43, 16  ;;  %v389_v37 = vcvt.s32.f32 %v387_v8  ;;  %v404_v25 = vcvt.s32.f32 %v402_v16  ;;  %v417_v18 = vand.u32 65535, %v817_v32 }
  0xbe   : > { %v249_v46 = vsel %vm233_vm2, %v693_v33, 32  ;;  %vm234_vm3 = vmor %vm202_vm1, %vm218_vm14  ;;  %v843_v47 = vcvt.s32.f32 %v433_v41  ;;  %v432_v30 = vand.u32 65535, %v831_v39  ;;  %v447_v32 = vand.u32 65535, %v839_v43 }
  0xbf   : > { %v250_v28 = vsel %vm234_vm3, %v693_v33, 32  ;;  %v847_v48 = vsel %vm138_vm0, %v249_v46, 2147483647  ;;  %v851_v29 = vcvt.s32.f32 %v448_v44  ;;  %v419_v46 = vcvt.s32.f32 %v417_v18 }
  0xc0   : > { %421 = vmin.xlane.f32.xlu1 %v828_v38  ;;  %436 = vmin.xlane.f32.xlu0 %v843_v47  ;;  %v463_v51 = vshra.s32 %v847_v48, 16  ;;  %v855_v53 = vsel %vm138_vm0, %v250_v28, 2147483647  ;;  %v434_v28 = vcvt.s32.f32 %v432_v30  ;;  %v462_v39 = vand.u32 65535, %v847_v48 }
  0xc1   : > { %v478_v54 = vshra.s32 %v855_v53, 16  ;;  %v449_v57 = vcvt.s32.f32 %v447_v32  ;;  %v477_v43 = vand.u32 65535, %v855_v53 }
  0xc2   : > { %v858_v56 = vcvt.s32.f32 %v463_v51 }
  0xc3   : > { %v862_v33 = vcvt.s32.f32 %v478_v54  ;;  %v479_v63 = vcvt.s32.f32 %v477_v43 }
  0xc4   : > { %451 = vmin.xlane.f32.xlu1 %v851_v29  ;;  %466 = vmin.xlane.f32.xlu0 %v858_v56 }
  0xc8   : > { %481 = vmin.xlane.f32.xlu1 %v862_v33 }
 0x135   : > { %v866_v58 = vpop.xlane.xlu0 %256 }
 0x136   : > { %vm258_vm0 = vcmp.eq.f32.partialorder %v714_v45, %v866_v58  ;;  %v263_v53 = vcvt.f32.s32 %v866_v58 }
 0x137   : > { %v259_v2 = vsel %vm258_vm0, %v254_v61, inf  ;;  %v464_v61 = vcvt.s32.f32 %v462_v39  ;;  %vm491_vm0 = vcmask 7168  }
 0x138   : > { %260 = vmin.xlane.f32.xlu0 %v259_v2 }
 0x139   : > { %v872_v3 = vpop.xlane.xlu1 %271  ;;  %v874_v4 = vpop.xlane.xlu0 %286 }
 0x13a   : > { %vm273_vm4 = vcmp.eq.f32.partialorder %v735_v55, %v872_v3  ;;  %vm288_vm5 = vcmp.eq.f32.partialorder %v719_v49, %v874_v4 }
 0x13b   : > { %v274_v42 = vsel %vm273_vm4, %v269_v7, inf  ;;  %v289_v45 = vsel %vm288_vm5, %v284_v9, inf  ;;  %v264_v7 = vshll.u32 %v263_v53, 16 }
 0x13c   : > { %275 = vmin.xlane.f32.xlu1 %v274_v42  ;;  %290 = vmin.xlane.f32.xlu0 %v289_v45 }
 0x13d   : > { %v882_v50 = vpop.xlane.xlu1 %301  ;;  %v884_v12 = vpop.xlane.xlu0 %316 }
 0x13e   : > { %vm303_vm6 = vcmp.eq.f32.partialorder %v740_v59, %v882_v50  ;;  %vm318_vm7 = vcmp.eq.f32.partialorder %v757_v1, %v884_v12  ;;  %v308_v10 = vcvt.f32.s32 %v882_v50 }
 0x13f   : > { %v304_v49 = vsel %vm303_vm6, %v299_v13, inf  ;;  %v319_v55 = vsel %vm318_vm7, %v314_v14, inf }
 0x140   : > { %305 = vmin.xlane.f32.xlu1 %v304_v49  ;;  %320 = vmin.xlane.f32.xlu0 %v319_v55  ;;  %v309_v60 = vshll.u32 %v308_v10, 16 }
 0x141   : > { %v892_v17 = vpop.xlane.xlu1 %331  ;;  %v894_v19 = vpop.xlane.xlu0 %346 }
 0x142   : > { %vm333_vm8 = vcmp.eq.f32.partialorder %v762_v5, %v892_v17  ;;  %vm348_vm9 = vcmp.eq.f32.partialorder %v779_v11, %v894_v19  ;;  %v338_v49 = vcvt.f32.s32 %v892_v17 }
 0x143   : > { %v334_v59 = vsel %vm333_vm8, %v329_v22, inf  ;;  %v349_v1 = vsel %vm348_vm9, %v344_v23, inf  ;;  %v353_v23 = vcvt.f32.s32 %v894_v19 }
 0x144   : > { %335 = vmin.xlane.f32.xlu1 %v334_v59  ;;  %350 = vmin.xlane.f32.xlu0 %v349_v1  ;;  %v339_v1 = vshll.u32 %v338_v49, 16 }
 0x145   : > { %v902_v26 = vpop.xlane.xlu1 %361  ;;  %v904_v21 = vpop.xlane.xlu0 %376  ;;  %v354_v8 = vshll.u32 %v353_v23, 16 }
 0x146   : > { %vm363_vm10 = vcmp.eq.f32.partialorder %v784_v15, %v902_v26  ;;  %vm378_vm11 = vcmp.eq.f32.partialorder %v801_v20, %v904_v21  ;;  %v383_v16 = vcvt.f32.s32 %v904_v21 }
 0x147   : > { %v364_v5 = vsel %vm363_vm10, %v359_v31, inf  ;;  %v379_v11 = vsel %vm378_vm11, %v374_v34, inf  ;;  %v368_v31 = vcvt.f32.s32 %v902_v26 }
 0x148   : > { %365 = vmin.xlane.f32.xlu1 %v364_v5  ;;  %380 = vmin.xlane.f32.xlu0 %v379_v11 }
 0x149   : > { %v912_v35 = vpop.xlane.xlu1 %391  ;;  %v914_v36 = vpop.xlane.xlu0 %406 }
 0x14a   : > { %vm393_vm12 = vcmp.eq.f32.partialorder %v806_v27, %v912_v35  ;;  %vm408_vm13 = vcmp.eq.f32.partialorder %v823_v24, %v914_v36  ;;  %v398_v18 = vcvt.f32.s32 %v912_v35 }
 0x14b   : > { %v394_v15 = vsel %vm393_vm12, %v389_v37, inf  ;;  %v409_v20 = vsel %vm408_vm13, %v404_v25, inf  ;;  %v369_v25 = vshll.u32 %v368_v31, 16 }
 0x14c   : > { %395 = vmin.xlane.f32.xlu1 %v394_v15  ;;  %410 = vmin.xlane.f32.xlu0 %v409_v20  ;;  %v384_v15 = vshll.u32 %v383_v16, 16  ;;  %v413_v20 = vcvt.f32.s32 %v914_v36  ;;  %v399_v39 = vshll.u32 %v398_v18, 16 }
 0x14d   : > { %v922_v41 = vpop.xlane.xlu1 %421  ;;  %v924_v44 = vpop.xlane.xlu0 %436 }
 0x14e   : > { %vm423_vm14 = vcmp.eq.f32.partialorder %v828_v38, %v922_v41  ;;  %vm438_vm15 = vcmp.eq.f32.partialorder %v843_v47, %v924_v44 }
 0x14f   : > { %v424_v27 = vsel %vm423_vm14, %v419_v46, inf  ;;  %v439_v24 = vsel %vm438_vm15, %v434_v28, inf }
 0x150   : > { %425 = vmin.xlane.f32.xlu1 %v424_v27  ;;  %440 = vmin.xlane.f32.xlu0 %v439_v24  ;;  %v428_v27 = vcvt.f32.s32 %v922_v41 }
 0x151   : > { %v932_v51 = vpop.xlane.xlu1 %451  ;;  %v934_v54 = vpop.xlane.xlu0 %466 }
 0x152   : > { %vm453_vm1 = vcmp.eq.f32.partialorder %v851_v29, %v932_v51  ;;  %vm468_vm2 = vcmp.eq.f32.partialorder %v858_v56, %v934_v54  ;;  %v278_v29 = vcvt.f32.s32 %v872_v3  ;;  %v293_v56 = vcvt.f32.s32 %v874_v4 }
 0x153   : > { %v454_v38 = vsel %vm453_vm1, %v449_v57, inf  ;;  %v469_v47 = vsel %vm468_vm2, %v464_v61, inf  ;;  %v323_v4 = vcvt.f32.s32 %v884_v12  ;;  %v414_v57 = vshll.u32 %v413_v20, 16 }
 0x154   : > { %455 = vmin.xlane.f32.xlu1 %v454_v38  ;;  %470 = vmin.xlane.f32.xlu0 %v469_v47  ;;  %v279_v40 = vshll.u32 %v278_v29, 16  ;;  %v294_v42 = vshll.u32 %v293_v56, 16  ;;  %v443_v61 = vcvt.f32.s32 %v924_v44 }
 0x155   : > { %v941_v48 = vpop.xlane.xlu1 %481  ;;  %v324_v50 = vshll.u32 %v323_v4, 16 }
 0x156   : > { %vm483_vm3 = vcmp.eq.f32.partialorder %v862_v33, %v941_v48  ;;  %v444_v29 = vshll.u32 %v443_v61, 16 }
 0x157   : > { %v484_v0 = vsel %vm483_vm3, %v479_v63, inf  ;;  %v429_v63 = vshll.u32 %v428_v27, 16 }
 0x158   : > { %485 = vmin.xlane.f32.xlu1 %v484_v0  ;;  %v458_v0 = vcvt.f32.s32 %v932_v51 }
 0x1c5   : > { %v261_v2 = vpop.xlane.xlu0 %260 }
 0x1c6   : > { %v262_v9 = vcvt.f32.s32 %v261_v2  ;;  %v473_v2 = vcvt.f32.s32 %v934_v54 }
 0x1c8   : > { %v265_v33 = vadd.s32 %v264_v7, %v262_v9  ;;  %v474_v10 = vshll.u32 %v473_v2, 16 }
 0x1c9   : > { %v276_v58 = vpop.xlane.xlu1 %275  ;;  %v291_v3 = vpop.xlane.xlu0 %290 }
 0x1ca   : > { %492 = vst.msk [vmem:[%s953_s15] sm:$0xff] %vm491_vm0, %v265_v33  ;;  %v277_v45 = vcvt.f32.s32 %v276_v58  ;;  %v292_v13 = vcvt.f32.s32 %v291_v3  ;;  %v459_v33 = vshll.u32 %v458_v0, 16  ;;  %v488_v58 = vcvt.f32.s32 %v941_v48 }
 0x1cc   : > { %v280_v14 = vadd.s32 %v279_v40, %v277_v45  ;;  %v295_v52 = vadd.s32 %v294_v42, %v292_v13  ;;  %v489_v13 = vshll.u32 %v488_v58, 16 }
 0x1cd   : > { %v306_v55 = vpop.xlane.xlu1 %305  ;;  %v321_v22 = vpop.xlane.xlu0 %320 }
 0x1ce   : > { %493 = vst.msk [vmem:[%s953_s15 + $0x8] sm:$0xff] %vm491_vm0, %v280_v14  ;;  %494 = vst.msk [vmem:[%s953_s15 + $0x10] sm:$0xff] %vm491_vm0, %v295_v52  ;;  %v307_v12 = vcvt.f32.s32 %v306_v55  ;;  %v322_v62 = vcvt.f32.s32 %v321_v22 }
 0x1d0   : > { %v310_v6 = vadd.s32 %v309_v60, %v307_v12  ;;  %v325_v59 = vadd.s32 %v324_v50, %v322_v62 }
 0x1d1   : > { %v336_v34 = vpop.xlane.xlu1 %335  ;;  %v351_v17 = vpop.xlane.xlu0 %350 }
 0x1d2   : > { %495 = vst.msk [vmem:[%s953_s15 + $0x18] sm:$0xff] %vm491_vm0, %v310_v6  ;;  %496 = vst.msk [vmem:[%s953_s15 + $0x20] sm:$0xff] %vm491_vm0, %v325_v59  ;;  %v337_v19 = vcvt.f32.s32 %v336_v34  ;;  %v352_v5 = vcvt.f32.s32 %v351_v17 }
 0x1d4   : > { %v340_v11 = vadd.s32 %v339_v1, %v337_v19  ;;  %v355_v37 = vadd.s32 %v354_v8, %v352_v5 }
 0x1d5   : > { %v366_v30 = vpop.xlane.xlu1 %365  ;;  %v381_v26 = vpop.xlane.xlu0 %380 }
 0x1d6   : > { %497 = vst.msk [vmem:[%s953_s15 + $0x28] sm:$0xff] %vm491_vm0, %v340_v11  ;;  %498 = vst.msk [vmem:[%s953_s15 + $0x30] sm:$0xff] %vm491_vm0, %v355_v37  ;;  %v367_v21 = vcvt.f32.s32 %v366_v30  ;;  %v382_v46 = vcvt.f32.s32 %v381_v26 }
 0x1d8   : > { %v370_v28 = vadd.s32 %v369_v25, %v367_v21  ;;  %v385_v32 = vadd.s32 %v384_v15, %v382_v46 }
 0x1d9   : > { %v396_v24 = vpop.xlane.xlu1 %395  ;;  %v411_v35 = vpop.xlane.xlu0 %410 }
 0x1da   : > { %499 = vst.msk [vmem:[%s953_s15 + $0x38] sm:$0xff] %vm491_vm0, %v370_v28  ;;  %500 = vst.msk [vmem:[%s953_s15 + $0x40] sm:$0xff] %vm491_vm0, %v385_v32  ;;  %v397_v36 = vcvt.f32.s32 %v396_v24  ;;  %v412_v43 = vcvt.f32.s32 %v411_v35 }
 0x1dc   : > { %v400_v38 = vadd.s32 %v399_v39, %v397_v36  ;;  %v415_v47 = vadd.s32 %v414_v57, %v412_v43 }
 0x1dd   : > { %v426_v41 = vpop.xlane.xlu1 %425  ;;  %v441_v53 = vpop.xlane.xlu0 %440 }
 0x1de   : > { %501 = vst.msk [vmem:[%s953_s15 + $0x48] sm:$0xff] %vm491_vm0, %v400_v38  ;;  %502 = vst.msk [vmem:[%s953_s15 + $0x50] sm:$0xff] %vm491_vm0, %v415_v47  ;;  %v427_v44 = vcvt.f32.s32 %v426_v41  ;;  %v442_v7 = vcvt.f32.s32 %v441_v53 }
 0x1e0   : > { %v430_v56 = vadd.s32 %v429_v63, %v427_v44  ;;  %v445_v9 = vadd.s32 %v444_v29, %v442_v7 }
 0x1e1   : > { %v456_v40 = vpop.xlane.xlu1 %455  ;;  %v471_v51 = vpop.xlane.xlu0 %470 }
 0x1e2   : > { %503 = vst.msk [vmem:[%s953_s15 + $0x58] sm:$0xff] %vm491_vm0, %v430_v56  ;;  %504 = vst.msk [vmem:[%s953_s15 + $0x60] sm:$0xff] %vm491_vm0, %v445_v9  ;;  %v457_v54 = vcvt.f32.s32 %v456_v40  ;;  %v472_v3 = vcvt.f32.s32 %v471_v51 }
 0x1e4   : > { %v460_v42 = vadd.s32 %v459_v33, %v457_v54  ;;  %v475_v4 = vadd.s32 %v474_v10, %v472_v3 }
 0x1e5   : > { %v486_v45 = vpop.xlane.xlu1 %485 }
 0x1e6   : > { %505 = vst.msk [vmem:[%s953_s15 + $0x68] sm:$0xff] %vm491_vm0, %v460_v42  ;;  %506 = vst.msk [vmem:[%s953_s15 + $0x70] sm:$0xff] %vm491_vm0, %v475_v4  ;;  %v487_v14 = vcvt.f32.s32 %v486_v45 }
 0x1e8   : > { %v490_v52 = vadd.s32 %v489_v13, %v487_v14 }
 0x1ea   : > { %507 = vst.msk [vmem:[%s953_s15 + $0x78] sm:$0xff] %vm491_vm0, %v490_v52 }
 0x1eb PF: > { %s11_s6 = sadd.s32 1, %s589_s6  }
 0x1ec   : > { %p8_p4 = scmp.ge.s32.totalorder %s11_s6, 6  }
 0x1ee   :  { %10 = sbr.rel (!%p8_p4) target bundleno = 1 (0x1), region = 54 }

</bundles_post_ra>
